<compile_context>
chip_gen: v6e
topology: v6e:2x2x1
jax: 0.10.0
libtpu: 0.0.40
codegen_flags: <defaults>
</compile_context>

<pallas_src>
import jax
import jax.numpy as jnp
from jax.experimental import pallas as pl
from jax.experimental.pallas import tpu as pltpu


# ----------------------------- Pallas kernel --------------------------------
def tabular_mlp_kernel(x_ref, w1_ref, b1_ref, w2_ref, b2_ref, w3_ref, b3_ref,
                       out_ref):
    # Layer 1: Linear over concat([emb, cont]); bn_cont already folded into W1/b1.
    h = jnp.dot(x_ref[...], w1_ref[...],
                preferred_element_type=jnp.float32) + b1_ref[...]
    h = jnp.maximum(h, 0.0).astype(w2_ref.dtype)      # ReLU (Dropout = identity)

    # Layer 2: bn1 folded into W2/b2.
    h = jnp.dot(h, w2_ref[...],
                preferred_element_type=jnp.float32) + b2_ref[...]
    h = jnp.maximum(h, 0.0).astype(w3_ref.dtype)

    # Output layer: bn2 folded into W3/b3; W3/b3 zero-padded to 128 lanes so
    # this is an unmasked, lane-dense store.
    out_ref[...] = (jnp.dot(h, w3_ref[...],
                            preferred_element_type=jnp.float32)
                    + b3_ref[...]).astype(out_ref.dtype)


# ------------------------------ helpers --------------------------------------
def _round_up(x, m):
    return ((x + m - 1) // m) * m


def fold_bn(gamma, beta, mean, var, eps=1e-5):
    scale = gamma / jnp.sqrt(var + eps)
    shift = beta - mean * scale
    return scale, shift


def fuse_params(params, n_emb, out_pad, compute_dtype):
    """Fold every eval-mode BatchNorm into the adjacent Linear (exact)."""
    cs, ct = fold_bn(*params["bn_cont"])
    s1, t1 = fold_bn(*params["bn1"])
    s2, t2 = fold_bn(*params["bn2"])

    w1 = params["w1"]                  # (n_emb + n_cont, H1)
    w1c = w1[n_emb:]                   # cont rows
    # x_cont_norm @ W1c == x_cont @ (cs[:,None]*W1c) + ct @ W1c
    w1_f = jnp.concatenate([w1[:n_emb], cs[:, None] * w1c], axis=0)
    b1_f = params["b1"] + ct @ w1c

    # (relu(h)*s1 + t1) @ W2 + b2 == relu(h) @ (s1[:,None]*W2) + (t1@W2 + b2)
    w2_f = s1[:, None] * params["w2"]
    b2_f = params["b2"] + t1 @ params["w2"]

    w3_f = s2[:, None] * params["w3"]
    b3_f = params["b3"] + t2 @ params["w3"]

    out_sz = w3_f.shape[1]
    w3_p = jnp.pad(w3_f, ((0, 0), (0, out_pad - out_sz)))
    b3_p = jnp.pad(b3_f, (0, out_pad - out_sz))

    return (w1_f.astype(compute_dtype), b1_f.reshape(1, -1).astype(jnp.float32),
            w2_f.astype(compute_dtype), b2_f.reshape(1, -1).astype(jnp.float32),
            w3_p.astype(compute_dtype), b3_p.reshape(1, -1).astype(jnp.float32))


# ------------------------------ wrapper --------------------------------------
def tabular_forward(x_cat, x_cont, params, *, tb=256,
                    compute_dtype=jnp.float32):
    # --- glue: embedding lookups (gathers); emb dropout = identity in eval ---
    embs = [jnp.take(tab, x_cat[:, i], axis=0)
            for i, tab in enumerate(params["emb_tables"])]
    n_emb = sum(t.shape[1] for t in params["emb_tables"])
    x = jnp.concatenate(embs + [x_cont.astype(jnp.float32)], axis=1)

    B, n_in = x.shape
    out_sz = params["w3"].shape[1]
    out_pad = _round_up(out_sz, 128)          # lane-dense output block

    w1, b1, w2, b2, w3, b3 = fuse_params(params, n_emb, out_pad, compute_dtype)
    H1, H2 = w1.shape[1], w2.shape[1]

    # --- batch tiling: pad to a multiple of the tile, slice afterwards ---
    tb_eff = min(_round_up(max(tb, 8), 8), _round_up(B, 8))
    B_pad = _round_up(B, tb_eff)
    if B_pad != B:
        x = jnp.pad(x, ((0, B_pad - B), (0, 0)))
    x = x.astype(compute_dtype)

    grid = (B_pad // tb_eff,)

    def const_spec(shape):
        # Constant index map: the weights/biases are a few KB, so default
        # double-buffering is harmless; no pipeline_mode override needed.
        return pl.BlockSpec(shape, lambda i: (0, 0))

    out = pl.pallas_call(
        tabular_mlp_kernel,
        out_shape=jax.ShapeDtypeStruct((B_pad, out_pad), jnp.float32),
        grid=grid,
        in_specs=[
            pl.BlockSpec((tb_eff, n_in), lambda i: (i, 0)),   # x tile
            const_spec((n_in, H1)),                           # W1 (bn_cont folded)
            const_spec((1, H1)),                              # b1
            const_spec((H1, H2)),                             # W2 (bn1 folded)
            const_spec((1, H2)),                              # b2
            const_spec((H2, out_pad)),                        # W3 (bn2 folded, padded)
            const_spec((1, out_pad)),                         # b3 (padded)
        ],
        out_specs=pl.BlockSpec((tb_eff, out_pad), lambda i: (i, 0)),
        compiler_params=pltpu.CompilerParams(
            dimension_semantics=("parallel",)),
    )(x, w1, b1, w2, b2, w3, b3)

    return out[:B, :out_sz]


# ------------------------- deterministic params -------------------------------
def init_params(key, emb_szs, n_cont, layers, out_sz):
    n_emb = sum(nf for _, nf in emb_szs)
    dims = [n_emb + n_cont] + list(layers)
    keys = jax.random.split(key, 32)
    ki = iter(range(32))

    params = {}
    params["emb_tables"] = [
        jax.random.normal(keys[next(ki)], (ni, nf), jnp.float32)
        for ni, nf in emb_szs
    ]

    def lin(kw, kb, din, dout):
        bound = 1.0 / jnp.sqrt(din)
        w = jax.random.uniform(kw, (din, dout), jnp.float32, -bound, bound)
        b = jax.random.uniform(kb, (dout,), jnp.float32, -bound, bound)
        return w, b

    def bn(kg, kb, km, kv, d):
        gamma = 1.0 + 0.1 * jax.random.normal(kg, (d,), jnp.float32)
        beta = 0.1 * jax.random.normal(kb, (d,), jnp.float32)
        mean = 0.1 * jax.random.normal(km, (d,), jnp.float32)
        var = 1.0 + 0.1 * jax.random.uniform(kv, (d,), jnp.float32)
        return gamma, beta, mean, var

    params["bn_cont"] = bn(keys[next(ki)], keys[next(ki)], keys[next(ki)],
                           keys[next(ki)], n_cont)
    params["w1"], params["b1"] = lin(keys[next(ki)], keys[next(ki)], dims[0], dims[1])
    params["bn1"] = bn(keys[next(ki)], keys[next(ki)], keys[next(ki)],
                       keys[next(ki)], dims[1])
    params["w2"], params["b2"] = lin(keys[next(ki)], keys[next(ki)], dims[1], dims[2])
    params["bn2"] = bn(keys[next(ki)], keys[next(ki)], keys[next(ki)],
                       keys[next(ki)], dims[2])
    params["w3"], params["b3"] = lin(keys[next(ki)], keys[next(ki)], dims[2], out_sz)
    return params


# ------------------------- pure-JAX reference ---------------------------------
def reference_forward(x_cat, x_cont, params):
    embs = [jnp.take(tab, x_cat[:, i], axis=0)
            for i, tab in enumerate(params["emb_tables"])]
    x = jnp.concatenate(embs, axis=1)
    cs, ct = fold_bn(*params["bn_cont"])
    xc = x_cont * cs.reshape(1, -1) + ct.reshape(1, -1)
    x = jnp.concatenate([x, xc], axis=1)
    h = x @ params["w1"] + params["b1"]
    h = jnp.maximum(h, 0.0)
    s1, t1 = fold_bn(*params["bn1"])
    h = h * s1.reshape(1, -1) + t1.reshape(1, -1)
    h = h @ params["w2"] + params["b2"]
    h = jnp.maximum(h, 0.0)
    s2, t2 = fold_bn(*params["bn2"])
    h = h * s2.reshape(1, -1) + t2.reshape(1, -1)
    return h @ params["w3"] + params["b3"]


if __name__ == "__main__":
    # Shapes mirror the exercise: 5 categorical cols, emb dim = min(50,(n+1)//2)
    cat_szs = [2, 16, 7, 9, 15]      # sex, education, marital, workclass, occupation
    emb_szs = [(s, min(50, (s + 1) // 2)) for s in cat_szs]   # n_emb = 26
    n_cont, out_sz = 2, 2
    layers = [32, 16]

    key = jax.random.PRNGKey(0)
    kp, kc1, kc2 = jax.random.split(key, 3)
    params = init_params(kp, emb_szs, n_cont, layers, out_sz)
    maxes = jnp.array(cat_szs, dtype=jnp.int32)

    # --- small batch (grid of 1, padded to 8 sublanes) ---
    B = 8
    x_cat = (jax.random.randint(kc1, (B, len(cat_szs)), 0, 10_000) % maxes).astype(jnp.int32)
    x_cont = jax.random.normal(kc2, (B, n_cont), jnp.float32)

    out = jax.block_until_ready(tabular_forward(x_cat, x_cont, params, tb=256))
    ref = reference_forward(x_cat, x_cont, params)
    assert out.shape == (B, out_sz)
    assert jnp.allclose(out, ref, atol=1e-4, rtol=1e-4), "f32 mismatch (B=8)"

    # --- non-multiple batch: exercises pad/slice and grid > 1 (tb=256) ---
    B2 = 300
    kc3, kc4 = jax.random.split(jax.random.PRNGKey(1))
    x_cat2 = (jax.random.randint(kc3, (B2, len(cat_szs)), 0, 10_000) % maxes).astype(jnp.int32)
    x_cont2 = jax.random.normal(kc4, (B2, n_cont), jnp.float32)

    out2 = jax.block_until_ready(tabular_forward(x_cat2, x_cont2, params, tb=256))
    ref2 = reference_forward(x_cat2, x_cont2, params)
    assert out2.shape == (B2, out_sz)
    assert jnp.allclose(out2, ref2, atol=1e-4, rtol=1e-4), "f32 mismatch (B=300)"

    # --- bf16 compute path (v6e/v7x-friendly), f32 MXU accumulation ---
    out2_bf16 = jax.block_until_ready(
        tabular_forward(x_cat2, x_cont2, params, tb=256,
                        compute_dtype=jnp.bfloat16))
    assert jnp.allclose(out2_bf16, ref2, atol=5e-2, rtol=5e-2), "bf16 mismatch"

    print("KERNEL_OK")
</pallas_src>

<mosaic_0001>
module attributes {stable_mosaic.version = 11 : i64} {
  func.func @tabular_mlp_kernel(%arg0: i32, %arg1: memref<8x28xf32, #tpu.memory_space<vmem>>, %arg2: memref<28x32xf32, #tpu.memory_space<vmem>>, %arg3: memref<1x32xf32, #tpu.memory_space<vmem>>, %arg4: memref<32x16xf32, #tpu.memory_space<vmem>>, %arg5: memref<1x16xf32, #tpu.memory_space<vmem>>, %arg6: memref<16x128xf32, #tpu.memory_space<vmem>>, %arg7: memref<1x128xf32, #tpu.memory_space<vmem>>, %arg8: memref<8x128xf32, #tpu.memory_space<vmem>>) attributes {dimension_semantics = [#tpu.dimension_semantics<parallel>], iteration_bounds = array<i64: 1>, scalar_prefetch = 0 : i64, scratch_operands = 0 : i64, tpu.core_type = #tpu.core_type<tc>, window_params = [{transform_indices = @transform_0, window_bounds = array<i64: 8, 28>}, {pipeline_mode = #tpu.pipeline_mode<synchronous>, transform_indices = @transform_1, window_bounds = array<i64: 28, 32>}, {pipeline_mode = #tpu.pipeline_mode<synchronous>, transform_indices = @transform_2, window_bounds = array<i64: 1, 32>}, {pipeline_mode = #tpu.pipeline_mode<synchronous>, transform_indices = @transform_3, window_bounds = array<i64: 32, 16>}, {pipeline_mode = #tpu.pipeline_mode<synchronous>, transform_indices = @transform_4, window_bounds = array<i64: 1, 16>}, {pipeline_mode = #tpu.pipeline_mode<synchronous>, transform_indices = @transform_5, window_bounds = array<i64: 16, 128>}, {pipeline_mode = #tpu.pipeline_mode<synchronous>, transform_indices = @transform_6, window_bounds = array<i64: 1, 128>}, {transform_indices = @transform_7, window_bounds = array<i64: 8, 128>}]} {
    %c0 = arith.constant 0 : index
    %c0_0 = arith.constant 0 : index
    %0 = vector.load %arg1[%c0, %c0_0] : memref<8x28xf32, #tpu.memory_space<vmem>>, vector<8x28xf32>
    %c0_1 = arith.constant 0 : index
    %c0_2 = arith.constant 0 : index
    %1 = vector.load %arg2[%c0_1, %c0_2] : memref<28x32xf32, #tpu.memory_space<vmem>>, vector<28x32xf32>
    %cst = arith.constant dense<0.000000e+00> : vector<8x32xf32>
    %2 = tpu.matmul %0, %1, %cst {dimension_numbers = #tpu.dot_dimension_numbers<[1], [0], [0], [1], [0, 0, 1, 1], [], []>} : vector<8x28xf32>, vector<28x32xf32>, vector<8x32xf32> -> vector<8x32xf32>
    %c0_3 = arith.constant 0 : index
    %c0_4 = arith.constant 0 : index
    %3 = vector.load %arg3[%c0_3, %c0_4] : memref<1x32xf32, #tpu.memory_space<vmem>>, vector<1x32xf32>
    %4 = vector.broadcast %3 : vector<1x32xf32> to vector<8x32xf32>
    %5 = arith.addf %2, %4 : vector<8x32xf32>
    %cst_5 = arith.constant 0.000000e+00 : f32
    %6 = vector.broadcast %cst_5 : f32 to vector<8x32xf32>
    %7 = arith.maximumf %5, %6 : vector<8x32xf32>
    %c0_6 = arith.constant 0 : index
    %c0_7 = arith.constant 0 : index
    %8 = vector.load %arg4[%c0_6, %c0_7] : memref<32x16xf32, #tpu.memory_space<vmem>>, vector<32x16xf32>
    %cst_8 = arith.constant dense<0.000000e+00> : vector<8x16xf32>
    %9 = tpu.matmul %7, %8, %cst_8 {dimension_numbers = #tpu.dot_dimension_numbers<[1], [0], [0], [1], [0, 0, 1, 1], [], []>} : vector<8x32xf32>, vector<32x16xf32>, vector<8x16xf32> -> vector<8x16xf32>
    %c0_9 = arith.constant 0 : index
    %c0_10 = arith.constant 0 : index
    %10 = vector.load %arg5[%c0_9, %c0_10] : memref<1x16xf32, #tpu.memory_space<vmem>>, vector<1x16xf32>
    %11 = vector.broadcast %10 : vector<1x16xf32> to vector<8x16xf32>
    %12 = arith.addf %9, %11 : vector<8x16xf32>
    %cst_11 = arith.constant 0.000000e+00 : f32
    %13 = vector.broadcast %cst_11 : f32 to vector<8x16xf32>
    %14 = arith.maximumf %12, %13 : vector<8x16xf32>
    %c0_12 = arith.constant 0 : index
    %c0_13 = arith.constant 0 : index
    %15 = vector.load %arg6[%c0_12, %c0_13] : memref<16x128xf32, #tpu.memory_space<vmem>>, vector<16x128xf32>
    %cst_14 = arith.constant dense<0.000000e+00> : vector<8x128xf32>
    %16 = tpu.matmul %14, %15, %cst_14 {dimension_numbers = #tpu.dot_dimension_numbers<[1], [0], [0], [1], [0, 0, 1, 1], [], []>} : vector<8x16xf32>, vector<16x128xf32>, vector<8x128xf32> -> vector<8x128xf32>
    %c0_15 = arith.constant 0 : index
    %c0_16 = arith.constant 0 : index
    %17 = vector.load %arg7[%c0_15, %c0_16] : memref<1x128xf32, #tpu.memory_space<vmem>>, vector<1x128xf32>
    %18 = vector.broadcast %17 : vector<1x128xf32> to vector<8x128xf32>
    %19 = arith.addf %16, %18 : vector<8x128xf32>
    %c0_17 = arith.constant 0 : index
    %c0_18 = arith.constant 0 : index
    %20 = vector.load %arg8[%c0_17, %c0_18] : memref<8x128xf32, #tpu.memory_space<vmem>>, vector<8x128xf32>
    tpu.vector_store %arg8[%c0_17, %c0_18], %19 {strides = array<i32>} : memref<8x128xf32, #tpu.memory_space<vmem>>, vector<8x128xf32>,
    return
  }
  func.func @transform_0(%arg0: i32) -> (i32, i32) {
    %c0_i32 = arith.constant 0 : i32
    %c0_i32_0 = arith.constant 0 : i32
    return %arg0, %c0_i32 : i32, i32
  }
  func.func @transform_1(%arg0: i32) -> (i32, i32) {
    %c0_i32 = arith.constant 0 : i32
    %c0_i32_0 = arith.constant 0 : i32
    %c0_i32_1 = arith.constant 0 : i32
    return %c0_i32, %c0_i32_0 : i32, i32
  }
  func.func @transform_2(%arg0: i32) -> (i32, i32) {
    %c0_i32 = arith.constant 0 : i32
    %c0_i32_0 = arith.constant 0 : i32
    %c0_i32_1 = arith.constant 0 : i32
    return %c0_i32, %c0_i32_0 : i32, i32
  }
  func.func @transform_3(%arg0: i32) -> (i32, i32) {
    %c0_i32 = arith.constant 0 : i32
    %c0_i32_0 = arith.constant 0 : i32
    %c0_i32_1 = arith.constant 0 : i32
    return %c0_i32, %c0_i32_0 : i32, i32
  }
  func.func @transform_4(%arg0: i32) -> (i32, i32) {
    %c0_i32 = arith.constant 0 : i32
    %c0_i32_0 = arith.constant 0 : i32
    %c0_i32_1 = arith.constant 0 : i32
    return %c0_i32, %c0_i32_0 : i32, i32
  }
  func.func @transform_5(%arg0: i32) -> (i32, i32) {
    %c0_i32 = arith.constant 0 : i32
    %c0_i32_0 = arith.constant 0 : i32
    %c0_i32_1 = arith.constant 0 : i32
    return %c0_i32, %c0_i32_0 : i32, i32
  }
  func.func @transform_6(%arg0: i32) -> (i32, i32) {
    %c0_i32 = arith.constant 0 : i32
    %c0_i32_0 = arith.constant 0 : i32
    %c0_i32_1 = arith.constant 0 : i32
    return %c0_i32, %c0_i32_0 : i32, i32
  }
  func.func @transform_7(%arg0: i32) -> (i32, i32) {
    %c0_i32 = arith.constant 0 : i32
    %c0_i32_0 = arith.constant 0 : i32
    return %arg0, %c0_i32 : i32, i32
  }
}

</mosaic_0001>

<bundles_post_ra>
// kernel: tpu_custom_call.1
= control target key start
LH: loop header
LB: loop body
LE: loop exit
PB: predicated region body
PF: predicated region fallthrough
CT: control target
= control target key end

     0   :  { %12 = vsyncpa [#allocation3], 0  ;;  %s504_s0 = inlined_call_operand.hbm [shape: f32[8,28], index: 0, kind: input, shape index: {}]   ;;  %s505_s1 = inlined_call_operand.vmem [shape: f32[28,32], index: 1, kind: input, shape index: {}]   ;;  %s506_s2 = inlined_call_operand.vmem [shape: f32[1,32], index: 2, kind: input, shape index: {}]   ;;  %s507_s3 = inlined_call_operand.vmem [shape: f32[32,16], index: 3, kind: input, shape index: {}]   ;;  %s508_s4 = inlined_call_operand.vmem [shape: f32[1,16], index: 4, kind: input, shape index: {}]   ;;  %s509_s5 = inlined_call_operand.vmem [shape: f32[16,128], index: 5, kind: input, shape index: {}]   ;;  %s510_s6 = inlined_call_operand.vmem [shape: f32[1,128], index: 6, kind: input, shape index: {}]   ;;  %s511_s7 = inlined_call_operand.hbm [shape: f32[8,128], index: 7, kind: output, shape index: {}]  }
   0x1   :  { %13 = vsyncpa [#allocation4], 0  ;;  %s412_s24 = smov [#allocation2]  }
   0x2   :  { %s20_s25 = sshll.u32 %s412_s24, 4  ;;  %s21_s25 = int_to_ptr.vmem [resolvable:$true] %s20_s25 }
   0x3   :  { %s376_s26 = scalar_lea.vmem %s21_s25, 128  ;;  %p381_p1 = scmp.lt.s32.totalorder %s21_s25, %s21_s25 }
   0x4   :  { %p377_p0 = scmp.ne.s32.totalorder %s21_s25, %s376_s26  ;;  %p382_p2 = scmp.lt.s32.totalorder %s376_s26, %s376_s26 }
   0x6   :  { %p383_p3 = por %p382_p2, %p381_p1 }
   0x8   :  { %p384_p4 = pnand %p383_p3, %p377_p0 }
   0xa   :  { %387 = shalt.err (!%p384_p4)
}
   0xb   :  { %23 = dma.hbm_to_vmem [thread:$0]  %s504_s0, 128, %s21_s25, [#allocation3]  }
   0xc   :  { %408 = dma.done.wait [#allocation3], 128  }
   0xd   :  { %409 = vsyncadd [#allocation3], 4294967168  ;;  %v413_v0 = vmov 0.0   ;;  %vm414_vm0 = vmmov 0   ;;  %vm55_vm1 = vcmask 1043456   ;;  %v42_v2 = vld [vmem:[%s505_s1 + $0x10] sm:$0xff] }
   0xe   :  { %335 = vmatprep.subr.mxu0 %v413_v0  ;;  %343 = vmatprep.mubr.msk.f32.mxu0 %vm414_vm0, %v413_v0  ;;  %v43_v1 = vld [vmem:[%s505_s1 + $0x18] sm:$0xf]  ;;  %v41_v4 = vld [vmem:[%s505_s1 + $0x8] sm:$0xff]  ;;  %v40_v5 = vld [vmem:[%s505_s1] sm:$0xff]  ;;  %vm51_vm2 = vcmask 228352   ;;  %vm141_vm3 = vcmask 261120  }
   0xf   :  { %346 = vmatprep.subr.mxu1 %v413_v0  ;;  %354 = vmatprep.mubr.msk.f32.mxu1 %vm414_vm0, %v413_v0  ;;  %v133_v3 = vld [vmem:[%s507_s3 + $0x18] sm:$0xff]  ;;  %v39_v6 = vld [vmem:[#allocation2] sm:$0xff]  ;;  %v132_v7 = vld [vmem:[%s507_s3 + $0x10] sm:$0xff]  ;;  %vm225_vm4 = vcmask 130048   ;;  %s415_s28 = smov [#allocation5]  }
  0x10   :  { %336 = vmatpush3.msk.msra.mxu0 %vm55_vm1, %v43_v1  ;;  %347 = vmatpush3.msra.mxu1 %v133_v3  ;;  %v131_v8 = vld [vmem:[%s507_s3 + $0x8] sm:$0xff]  ;;  %v130_v9 = vld [vmem:[%s507_s3] sm:$0xff]  ;;  %s306_s29 = sshll.u32 %s415_s28, 4  ;;  %s307_s29 = int_to_ptr.vmem [resolvable:$true] %s306_s29 }
  0x11   :  { %337 = vmatprep.subr.mxu0 %v413_v0  ;;  %348 = vmatprep.subr.mxu1 %v413_v0  ;;  %v315_v10 = vld [vmem:[%s506_s2] ss:$0 sm:$0xff]  ;;  %v217_v15 = vld [vmem:[%s509_s5 + $0x8] sm:$0xff]  ;;  %p393_p6 = scmp.lt.s32.totalorder %s307_s29, %s307_s29 }
  0x12   :  { %338 = vmatpush3.msra.mxu0 %v42_v2  ;;  %349 = vmatpush3.msra.mxu1 %v132_v7  ;;  %v216_v16 = vld [vmem:[%s509_s5] sm:$0xff]  ;;  %s388_s5 = scalar_lea.vmem %s307_s29, 128 }
  0x13   :  { %339 = vmatprep.subr.mxu0 %v413_v0  ;;  %350 = vmatprep.subr.mxu1 %v413_v0  ;;  %v318_v17 = vld [vmem:[%s508_s4] ss:$0 sm:$0xff]  ;;  %p389_p5 = scmp.ne.s32.totalorder %s307_s29, %s388_s5  ;;  %p394_p7 = scmp.lt.s32.totalorder %s388_s5, %s388_s5 }
  0x14   :  { %340 = vmatpush3.msra.mxu0 %v41_v4  ;;  %351 = vmatpush3.msra.mxu1 %v131_v8  ;;  %v320_v22 = vld [vmem:[%s510_s6] ss:$0 sm:$0xff] }
  0x15   :  { %341 = vmatprep.subr.mxu0 %v413_v0  ;;  %352 = vmatprep.subr.mxu1 %v413_v0  ;;  %p395_p8 = por %p394_p7, %p393_p6 }
  0x16   :  { %342 = vmatpush3.msra.mxu0 %v40_v5  ;;  %353 = vmatpush3.msra.mxu1 %v130_v9 }
  0x17   :  { %344 = vmatmul.mubr.msk.f32.vlgmr.msra.gmra.mxu0 %vm51_vm2, %v39_v6  ;;  %357 = vmatprep.subr.mxu0 %v413_v0  ;;  %p396_p9 = pnand %p395_p8, %p389_p5 }
  0x18   :  { %361 = vmatprep.mubr.msk.f32.mxu0 %vm414_vm0, %v413_v0  ;;  %358 = vmatpush3.msra.mxu0 %v217_v15 }
  0x19   :  { %359 = vmatprep.subr.mxu0 %v413_v0 }
  0x1a   :  { %360 = vmatpush3.msra.mxu0 %v216_v16 }
  0xd7   :  { %v125_v11 = vpop.f32.mrf.mxu0 }
  0xd8   :  { %v126_v12 = vadd.f32 %v315_v10, %v125_v11 }
  0xd9   :  { %v345_v13 = vpop.f32.mrf.mxu0 }
  0xda   :  { %v129_v14 = vmax.f32 %v126_v12, 0.0 }
  0xdc   :  { %355 = vmatmul.mubr.msk.f32.vlgmr.msra.gmra.mxu1 %vm141_vm3, %v129_v14 }
 0x19c   :  { %v211_v18 = vpop.f32.mrf.mxu1 }
 0x19d   :  { %v212_v19 = vadd.f32 %v318_v17, %v211_v18 }
 0x19e   :  { %v356_v20 = vpop.f32.mrf.mxu1 }
 0x19f   :  { %v215_v21 = vmax.f32 %v212_v19, 0.0 }
 0x1a1   :  { %362 = vmatmul.mubr.msk.f32.vlgmr.msra.gmra.mxu0 %vm225_vm4, %v215_v21 }
 0x261   :  { %v295_v23 = vpop.f32.mrf.mxu0 }
 0x262   :  { %v296_v24 = vadd.f32 %v320_v22, %v295_v23 }
 0x263   :  { %v363_v25 = vpop.f32.mrf.mxu0 }
 0x264   :  { %299 = vst [vmem:[#allocation5] sm:$0xff] %v296_v24 }
 0x265   :  { %399 = shalt.err (!%p396_p9)
}
 0x266   :  { %309 = dma.vmem_to_hbm [thread:$0]  %s307_s29, 128, %s511_s7, [#allocation4]  }
 0x267   :  { %410 = dma.done.wait [#allocation4], 128  }
 0x268   :  { %411 = vsyncadd [#allocation4], 4294967168 }
 0x269   :  { %313 = vsyncpa [#allocation3], 1 }
 0x26a   :  { %314 = vsyncpa [#allocation4], 1 }

</bundles_post_ra>
